<compile_context>
chip_gen: v5e
topology: v5e:2x2
jax: 0.10.0
libtpu: 0.0.40
codegen_flags: <defaults>
</compile_context>

<pallas_src>
import functools
import math

import jax
import jax.numpy as jnp
from jax import lax
from jax.experimental import pallas as pl
from jax.experimental.pallas import tpu as pltpu

_NEG_BIG = -1e30  # finite "-inf" used to mask padded rows/columns


def _clip_lse_kernel(scale_ref, s_ref, t_ref,
                     row_lse_ref, col_m_ref, col_l_ref,
                     m_row, l_row,
                     *, n, block_m, block_n, masked, resident_t):
    i = pl.program_id(0)
    j = pl.program_id(1)
    n_j = pl.num_programs(1)

    # ---- start of a row sweep: reset online row-LSE state -------------------
    @pl.when(j == 0)
    def _():
        m_row[...] = jnp.full((block_m, 1), -jnp.inf, jnp.float32)
        l_row[...] = jnp.zeros((block_m, 1), jnp.float32)

    # ---- logits tile: native-dtype MXU feed, f32 accumulation & scaling -----
    s = s_ref[...]                                           # (bm, D)
    if resident_t:
        start = pl.multiple_of(j * block_n, block_n)
        t = t_ref[pl.ds(start, block_n), :]                  # slice resident T
    else:
        t = t_ref[...]                                       # (bn, D)
    logits = lax.dot_general(
        s, t, dimension_numbers=(((1,), (1,)), ((), ())),
        preferred_element_type=jnp.float32)                  # (bm, bn) f32
    logits = logits * scale_ref[0]                           # scale in f32

    if masked:  # static Python flag: zero overhead when N divides the grid
        row_ok = (i * block_m
                  + lax.broadcasted_iota(jnp.int32, (block_m, 1), 0)) < n
        col_ok = (j * block_n
                  + lax.broadcasted_iota(jnp.int32, (1, block_n), 1)) < n
        logits = jnp.where(jnp.logical_and(row_ok, col_ok), logits, _NEG_BIG)

    # ---- online row-direction LSE; the single (bm, bn) exp of this tile -----
    row_max = jnp.max(logits, axis=1, keepdims=True)         # (bm, 1)
    m_old = m_row[...]
    m_new = jnp.maximum(m_old, row_max)
    e = jnp.exp(logits - m_new)                              # only big exp
    l_row[...] = (l_row[...] * jnp.exp(m_old - m_new)
                  + jnp.sum(e, axis=1, keepdims=True))
    m_row[...] = m_new

    # ---- column-direction partials for this (i, j) tile, derived from e -----
    # sum_r exp(logits[r,c] - K) == sum_r e[r,c] * exp(m_new[r] - K),
    # with K = max_r m_new[r]  (so every factor is <= 1: overflow-free).
    k_ref = jnp.max(m_new, axis=0, keepdims=True)            # (1, 1)
    f = jnp.exp(m_new - k_ref)                               # (bm, 1) in (0,1]
    # NOTE: if the XLU ever saturates, this sum can move to the MXU as
    # lax.dot_general(f, e) contracting the row axis.
    w = jnp.sum(e * f, axis=0, keepdims=True)                # (1, bn)
    col_m_ref[0] = k_ref * jnp.ones((1, block_n), jnp.float32)
    col_l_ref[0] = w

    # ---- finalize the row LSE once per row sweep -----------------------------
    @pl.when(j == n_j - 1)
    def _():
        row_lse_ref[...] = m_row[...] + jnp.log(l_row[...])


def _round_up(x, m):
    return ((x + m - 1) // m) * m


def _choose_tiles(n, d, itemsize):
    """Auto (block_m, block_n): single full tile for small N, else rectangular."""
    if n <= 512:
        bm = bn = _round_up(n, 8)
        return bm, bn
    bn = 256
    bm = 1024
    # Keep double-buffered S blocks + f32 logits/exp temps comfortably in VMEM
    # (v7x only has 64 MiB physical).
    while bm > 256 and (2 * bm * d * itemsize + 3 * bm * bn * 4) > 24 * (1 << 20):
        bm //= 2
    return bm, bn


def clip_loss(source_features, target_features, logit_scale=1.0, *,
              block_m=None, block_n=None, resident_t=None):
    """Pallas implementation of CLIPLoss.forward. Inputs (1, N, D) or (N, D)."""
    assert source_features.shape == target_features.shape
    if source_features.ndim == 3:
        b, n, d = source_features.shape
        assert b == 1, "PyTorch CLIPLoss label shape (1, N) implies batch size 1"
        s2 = source_features.reshape(n, d)
        t2 = target_features.reshape(n, d)
    else:
        n, d = source_features.shape
        s2, t2 = source_features, target_features

    itemsize = jnp.dtype(s2.dtype).itemsize
    if block_m is None or block_n is None:
        abm, abn = _choose_tiles(n, d, itemsize)
        block_m = abm if block_m is None else block_m
        block_n = abn if block_n is None else block_n

    n_pad = _round_up(n, math.lcm(block_m, block_n, 8))
    assert block_m % 8 == 0 or block_m == n_pad
    assert block_n % 128 == 0 or block_n == n_pad, (
        "block_n must be a multiple of 128 or span the whole padded N")
    n_i = n_pad // block_m
    n_j = n_pad // block_n
    masked = (n_pad != n)

    if resident_t is None:  # keep T fully VMEM-resident when it is small enough
        resident_t = (n_pad * d * itemsize) <= 12 * (1 << 20)

    if masked:
        pad = [(0, n_pad - n), (0, 0)]
        s_in = jnp.pad(s2, pad)
        t_in = jnp.pad(t2, pad)
    else:
        s_in, t_in = s2, t2

    scale = jnp.asarray(logit_scale, dtype=jnp.float32).reshape(1)

    if resident_t:
        t_spec = pl.BlockSpec((n_pad, d), lambda i, j: (0, 0))   # DMA'd once
    else:
        t_spec = pl.BlockSpec((block_n, d), lambda i, j: (j, 0))  # streamed

    kernel = functools.partial(
        _clip_lse_kernel, n=n, block_m=block_m, block_n=block_n,
        masked=masked, resident_t=resident_t)

    t_reads = 1 if resident_t else n_i
    cost = pl.CostEstimate(
        flops=int(2 * n_pad * n_pad * d + 3 * n_pad * n_pad),
        transcendentals=int(n_pad * n_pad + 2 * n_pad * n_j),
        bytes_accessed=int(itemsize * n_pad * d * (1 + t_reads)
                           + 4 * (n_pad + 2 * n_i * n_pad)),
    )

    row_lse, col_m, col_l = pl.pallas_call(
        kernel,
        out_shape=(
            jax.ShapeDtypeStruct((n_pad, 1), jnp.float32),        # row LSE
            jax.ShapeDtypeStruct((n_i, 1, n_pad), jnp.float32),   # col ref max
            jax.ShapeDtypeStruct((n_i, 1, n_pad), jnp.float32),   # col sumexp
        ),
        grid=(n_i, n_j),
        in_specs=[
            pl.BlockSpec(memory_space=pltpu.MemorySpace.SMEM),    # logit_scale
            pl.BlockSpec((block_m, d), lambda i, j: (i, 0)),      # source rows
            t_spec,                                               # target rows
        ],
        out_specs=(
            pl.BlockSpec((block_m, 1), lambda i, j: (i, 0)),
            pl.BlockSpec((1, 1, block_n), lambda i, j: (i, 0, j)),
            pl.BlockSpec((1, 1, block_n), lambda i, j: (i, 0, j)),
        ),
        scratch_shapes=[
            pltpu.VMEM((block_m, 1), jnp.float32),                # m_row
            pltpu.VMEM((block_m, 1), jnp.float32),                # l_row
        ],
        compiler_params=pltpu.CompilerParams(
            # Row axis carries no cross-block state -> megacore-splittable.
            dimension_semantics=("parallel", "arbitrary"),
            vmem_limit_bytes=40 * 1024 * 1024,
        ),
        cost_estimate=cost,
    )(scale, s_in, t_in)

    # ---- tiny JAX epilogue: merge column partials across row blocks ---------
    row_sum = jnp.sum(row_lse[:n, 0])

    cm = col_m[:, 0, :]                                      # (n_i, n_pad)
    cl = col_l[:, 0, :]
    big_m = jnp.max(cm, axis=0)                              # (n_pad,)
    col_lse = big_m + jnp.log(jnp.sum(cl * jnp.exp(cm - big_m), axis=0))
    col_sum = jnp.sum(col_lse[:n])

    # Diagonal straight from the (unpadded) features, in f32, scale applied in f32.
    s32 = s2.astype(jnp.float32)
    t32 = t2.astype(jnp.float32)
    diag_sum = jnp.sum(scale[0] * jnp.sum(s32 * t32, axis=-1))

    return (row_sum + col_sum - 2.0 * diag_sum) / (2.0 * n)


def _ref_loss(source_features, target_features, logit_scale=1.0):
    """Pure-JAX reference mirroring the PyTorch semantics exactly."""
    s = source_features.astype(jnp.float32)
    t = target_features.astype(jnp.float32)
    if s.ndim == 2:
        s, t = s[None], t[None]
    logits = logit_scale * jnp.einsum("bnd,bmd->bnm", s, t)          # source_logits
    diag = jnp.diagonal(logits, axis1=1, axis2=2)                    # (B, N)
    lse_src = jax.nn.logsumexp(logits, axis=1)                       # per-column LSE
    ce_src = jnp.mean(lse_src - diag)
    lse_tgt = jax.nn.logsumexp(jnp.swapaxes(logits, 1, 2), axis=1)   # per-row LSE
    ce_tgt = jnp.mean(lse_tgt - diag)
    return (ce_src + ce_tgt) / 2.0


if __name__ == "__main__":
    key = jax.random.PRNGKey(0)
    ks = jax.random.split(key, 6)

    # Case 1: module defaults (logit_scale=1.0), batch-1 inputs, single tile.
    B, N, D = 1, 8, 32
    s1 = jax.random.normal(ks[0], (B, N, D), dtype=jnp.float32)
    t1 = jax.random.normal(ks[1], (B, N, D), dtype=jnp.float32)
    out1 = clip_loss(s1, t1, 1.0)
    jax.block_until_ready(out1)
    ref1 = _ref_loss(s1, t1, 1.0)
    assert jnp.allclose(out1, ref1, atol=1e-3, rtol=1e-3), (out1, ref1)

    # Case 2: 2x2 grid of 128x128 tiles, streamed target path, non-default
    # scale -- exercises the online row LSE and cross-block column merge.
    N2, D2 = 256, 64
    s2 = jax.random.normal(ks[2], (1, N2, D2), dtype=jnp.float32)
    t2 = jax.random.normal(ks[3], (1, N2, D2), dtype=jnp.float32)
    out2 = clip_loss(s2, t2, 2.5, block_m=128, block_n=128, resident_t=False)
    jax.block_until_ready(out2)
    ref2 = _ref_loss(s2, t2, 2.5)
    assert jnp.allclose(out2, ref2, atol=1e-3, rtol=1e-3), (out2, ref2)

    # Case 3: awkward N -> padding + in-kernel masking, VMEM-resident target,
    # 3x3 grid with in-kernel pl.ds slicing of the resident T.
    N3, D3 = 330, 48
    s3 = jax.random.normal(ks[4], (1, N3, D3), dtype=jnp.float32)
    t3 = jax.random.normal(ks[5], (1, N3, D3), dtype=jnp.float32)
    out3 = clip_loss(s3, t3, 3.0, block_m=128, block_n=128)
    jax.block_until_ready(out3)
    ref3 = _ref_loss(s3, t3, 3.0)
    assert jnp.allclose(out3, ref3, atol=1e-3, rtol=1e-3), (out3, ref3)

    print("KERNEL_OK")
</pallas_src>

<mosaic_0001>
module attributes {stable_mosaic.version = 11 : i64} {
  func.func @_clip_lse_kernel(%arg0: i32, %arg1: i32, %arg2: memref<1xf32, #tpu.memory_space<smem>>, %arg3: memref<8x32xf32, #tpu.memory_space<vmem>>, %arg4: memref<8x32xf32, #tpu.memory_space<vmem>>, %arg5: memref<8x1xf32, #tpu.memory_space<vmem>>, %arg6: memref<1x1x8xf32, #tpu.memory_space<vmem>>, %arg7: memref<1x1x8xf32, #tpu.memory_space<vmem>>, %arg8: memref<8x1xf32, #tpu.memory_space<vmem>>, %arg9: memref<8x1xf32, #tpu.memory_space<vmem>>) attributes {dimension_semantics = [#tpu.dimension_semantics<parallel>, #tpu.dimension_semantics<arbitrary>], iteration_bounds = array<i64: 1, 1>, scalar_prefetch = 0 : i64, scratch_operands = 2 : i64, tpu.core_type = #tpu.core_type<tc>, window_params = [{transform_indices = @transform_0, window_bounds = array<i64: 1>}, {transform_indices = @transform_1, window_bounds = array<i64: 8, 32>}, {pipeline_mode = #tpu.pipeline_mode<synchronous>, transform_indices = @transform_2, window_bounds = array<i64: 8, 32>}, {transform_indices = @transform_3, window_bounds = array<i64: 8, 1>}, {transform_indices = @transform_4, window_bounds = array<i64: 1, 1, 8>}, {transform_indices = @transform_5, window_bounds = array<i64: 1, 1, 8>}]} {
    %c0_i32 = arith.constant 0 : i32
    %0 = arith.cmpi eq, %arg1, %c0_i32 : i32
    %1 = arith.extui %0 : i1 to i32
    %c0_i32_0 = arith.constant 0 : i32
    %2 = arith.cmpi ne, %1, %c0_i32_0 : i32
    scf.if %2 {
      %cst_25 = arith.constant 0xFF800000 : f32
      %49 = vector.broadcast %cst_25 : f32 to vector<8x1xf32>
      %c0_26 = arith.constant 0 : index
      %c0_27 = arith.constant 0 : index
      %50 = vector.load %arg8[%c0_26, %c0_27] : memref<8x1xf32, #tpu.memory_space<vmem>>, vector<8x1xf32>
      tpu.vector_store %arg8[%c0_26, %c0_27], %49 {strides = array<i32>} : memref<8x1xf32, #tpu.memory_space<vmem>>, vector<8x1xf32>,
      %cst_28 = arith.constant 0.000000e+00 : f32
      %51 = vector.broadcast %cst_28 : f32 to vector<8x1xf32>
      %c0_29 = arith.constant 0 : index
      %c0_30 = arith.constant 0 : index
      %52 = vector.load %arg9[%c0_29, %c0_30] : memref<8x1xf32, #tpu.memory_space<vmem>>, vector<8x1xf32>
      tpu.vector_store %arg9[%c0_29, %c0_30], %51 {strides = array<i32>} : memref<8x1xf32, #tpu.memory_space<vmem>>, vector<8x1xf32>,
    } else {
    }
    %c0 = arith.constant 0 : index
    %c0_1 = arith.constant 0 : index
    %3 = vector.load %arg3[%c0, %c0_1] : memref<8x32xf32, #tpu.memory_space<vmem>>, vector<8x32xf32>
    %c8_i32 = arith.constant 8 : i32
    %4 = arith.muli %arg1, %c8_i32 : i32
    %5 = tpu.assume_multiple %4, 8 : i32
    %6 = arith.index_cast %5 : i32 to index
    %c0_2 = arith.constant 0 : index
    %7 = vector.load %arg4[%6, %c0_2] : memref<8x32xf32, #tpu.memory_space<vmem>>, vector<8x32xf32>
    %cst = arith.constant dense<0.000000e+00> : vector<8x8xf32>
    %8 = tpu.matmul %3, %7, %cst {dimension_numbers = #tpu.dot_dimension_numbers<[1], [1], [0], [0], [0, 0, 1, 0], [], []>} : vector<8x32xf32>, vector<8x32xf32>, vector<8x8xf32> -> vector<8x8xf32>
    %c0_3 = arith.constant 0 : index
    %9 = memref.load %arg2[%c0_3] : memref<1xf32, #tpu.memory_space<smem>>
    %10 = vector.broadcast %9 : f32 to vector<8x8xf32>
    %11 = arith.mulf %8, %10 : vector<8x8xf32>
    %cst_4 = arith.constant dense<0xFF800000> : vector<8xf32>
    %12 = vector.multi_reduction <maximumf>, %11, %cst_4 [1] : vector<8x8xf32> to vector<8xf32>
    %13 = vector.shape_cast %12 : vector<8xf32> to vector<8x1xf32>
    %c0_5 = arith.constant 0 : index
    %c0_6 = arith.constant 0 : index
    %14 = vector.load %arg8[%c0_5, %c0_6] : memref<8x1xf32, #tpu.memory_space<vmem>>, vector<8x1xf32>
    %15 = arith.maximumf %14, %13 : vector<8x1xf32>
    %16 = vector.broadcast %15 : vector<8x1xf32> to vector<8x8xf32>
    %17 = arith.subf %11, %16 : vector<8x8xf32>
    %18 = math.exp %17 : vector<8x8xf32>
    %c0_7 = arith.constant 0 : index
    %c0_8 = arith.constant 0 : index
    %19 = vector.load %arg9[%c0_7, %c0_8] : memref<8x1xf32, #tpu.memory_space<vmem>>, vector<8x1xf32>
    %20 = arith.subf %14, %15 : vector<8x1xf32>
    %21 = math.exp %20 : vector<8x1xf32>
    %22 = arith.mulf %19, %21 : vector<8x1xf32>
    %cst_9 = arith.constant dense<0.000000e+00> : vector<8xf32>
    %23 = vector.multi_reduction <add>, %18, %cst_9 [1] : vector<8x8xf32> to vector<8xf32>
    %24 = vector.shape_cast %23 : vector<8xf32> to vector<8x1xf32>
    %25 = arith.addf %22, %24 : vector<8x1xf32>
    %c0_10 = arith.constant 0 : index
    %c0_11 = arith.constant 0 : index
    %26 = vector.load %arg9[%c0_10, %c0_11] : memref<8x1xf32, #tpu.memory_space<vmem>>, vector<8x1xf32>
    tpu.vector_store %arg9[%c0_10, %c0_11], %25 {strides = array<i32>} : memref<8x1xf32, #tpu.memory_space<vmem>>, vector<8x1xf32>,
    %c0_12 = arith.constant 0 : index
    %c0_13 = arith.constant 0 : index
    %27 = vector.load %arg8[%c0_12, %c0_13] : memref<8x1xf32, #tpu.memory_space<vmem>>, vector<8x1xf32>
    tpu.vector_store %arg8[%c0_12, %c0_13], %15 {strides = array<i32>} : memref<8x1xf32, #tpu.memory_space<vmem>>, vector<8x1xf32>,
    %cst_14 = arith.constant dense<0xFF800000> : vector<1xf32>
    %28 = vector.multi_reduction <maximumf>, %15, %cst_14 [0] : vector<8x1xf32> to vector<1xf32>
    %29 = vector.shape_cast %28 : vector<1xf32> to vector<1x1xf32>
    %30 = vector.broadcast %29 : vector<1x1xf32> to vector<8x1xf32>
    %31 = arith.subf %15, %30 : vector<8x1xf32>
    %32 = math.exp %31 : vector<8x1xf32>
    %33 = vector.broadcast %32 : vector<8x1xf32> to vector<8x8xf32>
    %34 = arith.mulf %18, %33 : vector<8x8xf32>
    %cst_15 = arith.constant dense<0.000000e+00> : vector<8xf32>
    %35 = vector.multi_reduction <add>, %34, %cst_15 [0] : vector<8x8xf32> to vector<8xf32>
    %36 = vector.shape_cast %35 : vector<8xf32> to vector<1x8xf32>
    %cst_16 = arith.constant 1.000000e+00 : f32
    %37 = vector.broadcast %cst_16 : f32 to vector<1x8xf32>
    %38 = vector.broadcast %29 : vector<1x1xf32> to vector<1x8xf32>
    %39 = arith.mulf %38, %37 : vector<1x8xf32>
    %c0_17 = arith.constant 0 : index
    %c0_18 = arith.constant 0 : index
    %c0_19 = arith.constant 0 : index
    %40 = vector.load %arg6[%c0_17, %c0_18, %c0_19] : memref<1x1x8xf32, #tpu.memory_space<vmem>>, vector<1x1x8xf32>
    %41 = vector.shape_cast %40 : vector<1x1x8xf32> to vector<1x8xf32>
    %42 = vector.shape_cast %39 : vector<1x8xf32> to vector<1x1x8xf32>
    tpu.vector_store %arg6[%c0_17, %c0_18, %c0_19], %42 {strides = array<i32>} : memref<1x1x8xf32, #tpu.memory_space<vmem>>, vector<1x1x8xf32>,
    %c0_20 = arith.constant 0 : index
    %c0_21 = arith.constant 0 : index
    %c0_22 = arith.constant 0 : index
    %43 = vector.load %arg7[%c0_20, %c0_21, %c0_22] : memref<1x1x8xf32, #tpu.memory_space<vmem>>, vector<1x1x8xf32>
    %44 = vector.shape_cast %43 : vector<1x1x8xf32> to vector<1x8xf32>
    %45 = vector.shape_cast %36 : vector<1x8xf32> to vector<1x1x8xf32>
    tpu.vector_store %arg7[%c0_20, %c0_21, %c0_22], %45 {strides = array<i32>} : memref<1x1x8xf32, #tpu.memory_space<vmem>>, vector<1x1x8xf32>,
    %c0_i32_23 = arith.constant 0 : i32
    %46 = arith.cmpi eq, %arg1, %c0_i32_23 : i32
    %47 = arith.extui %46 : i1 to i32
    %c0_i32_24 = arith.constant 0 : i32
    %48 = arith.cmpi ne, %47, %c0_i32_24 : i32
    scf.if %48 {
      %c0_25 = arith.constant 0 : index
      %c0_26 = arith.constant 0 : index
      %49 = vector.load %arg8[%c0_25, %c0_26] : memref<8x1xf32, #tpu.memory_space<vmem>>, vector<8x1xf32>
      %c0_27 = arith.constant 0 : index
      %c0_28 = arith.constant 0 : index
      %50 = vector.load %arg9[%c0_27, %c0_28] : memref<8x1xf32, #tpu.memory_space<vmem>>, vector<8x1xf32>
      %51 = math.log %50 : vector<8x1xf32>
      %52 = arith.addf %49, %51 : vector<8x1xf32>
      %c0_29 = arith.constant 0 : index
      %c0_30 = arith.constant 0 : index
      %53 = vector.load %arg5[%c0_29, %c0_30] : memref<8x1xf32, #tpu.memory_space<vmem>>, vector<8x1xf32>
      tpu.vector_store %arg5[%c0_29, %c0_30], %52 {strides = array<i32>} : memref<8x1xf32, #tpu.memory_space<vmem>>, vector<8x1xf32>,
    } else {
    }
    return
  }
  func.func @transform_0(%arg0: i32, %arg1: i32) -> i32 {
    %c0_i32 = arith.constant 0 : i32
    %c0_i32_0 = arith.constant 0 : i32
    return %c0_i32 : i32
  }
  func.func @transform_1(%arg0: i32, %arg1: i32) -> (i32, i32) {
    %c0_i32 = arith.constant 0 : i32
    %c0_i32_0 = arith.constant 0 : i32
    return %arg0, %c0_i32 : i32, i32
  }
  func.func @transform_2(%arg0: i32, %arg1: i32) -> (i32, i32) {
    %c0_i32 = arith.constant 0 : i32
    %c0_i32_0 = arith.constant 0 : i32
    %c0_i32_1 = arith.constant 0 : i32
    return %c0_i32, %c0_i32_0 : i32, i32
  }
  func.func @transform_3(%arg0: i32, %arg1: i32) -> (i32, i32) {
    %c0_i32 = arith.constant 0 : i32
    %c0_i32_0 = arith.constant 0 : i32
    return %arg0, %c0_i32 : i32, i32
  }
  func.func @transform_4(%arg0: i32, %arg1: i32) -> (i32, i32, i32) {
    %c0_i32 = arith.constant 0 : i32
    %c0_i32_0 = arith.constant 0 : i32
    return %arg0, %c0_i32, %arg1 : i32, i32, i32
  }
  func.func @transform_5(%arg0: i32, %arg1: i32) -> (i32, i32, i32) {
    %c0_i32 = arith.constant 0 : i32
    %c0_i32_0 = arith.constant 0 : i32
    return %arg0, %c0_i32, %arg1 : i32, i32, i32
  }
}

</mosaic_0001>

<bundles_post_ra>
// kernel: tpu_custom_call.1
= control target key start
LH: loop header
LB: loop body
LE: loop exit
PB: predicated region body
PF: predicated region fallthrough
CT: control target
= control target key end

     0   :  { %12 = vsyncpa [#allocation6], 0  ;;  %s383_s0 = inlined_call_operand.<no memory space> [shape: f32[1], index: 0, kind: input, shape index: {}]   ;;  %s384_s1 = inlined_call_operand.hbm [shape: f32[8,32], index: 1, kind: input, shape index: {}]   ;;  %s385_s2 = inlined_call_operand.hbm [shape: f32[8,32], index: 2, kind: input, shape index: {}]   ;;  %s386_s3 = inlined_call_operand.vmem [shape: f32[8,1], index: 3, kind: output, shape index: {0}]   ;;  %s387_s4 = inlined_call_operand.hbm [shape: f32[1,1,8], index: 4, kind: output, shape index: {1}]   ;;  %s388_s5 = inlined_call_operand.hbm [shape: f32[1,1,8], index: 5, kind: output, shape index: {2}]  }
   0x1   :  { %13 = vsyncpa [#allocation9], 0 }
   0x2   :  { %14 = vsyncpa [#allocation7], 0 }
   0x3   :  { %15 = vsyncpa [#allocation12], 0  ;;  %s23_s20 = sshll.u32 %s384_s1, 4  ;;  %s317_s21 = smov [#allocation5]   ;;  %s24_s20 = int_to_ptr.hbm [resolvable:$true] %s23_s20 }
   0x4   :  { %s25_s22 = sshll.u32 %s317_s21, 4  ;;  %s34_s25 = sshll.u32 %s385_s2, 4  ;;  %s26_s22 = int_to_ptr.vmem [resolvable:$true] %s25_s22  ;;  %s35_s25 = int_to_ptr.hbm [resolvable:$true] %s34_s25 }
   0x5   :  { %28 = dma.hbm_to_vmem [thread:$0]  %s24_s20, 128, %s26_s22, [#allocation6]  }
   0x6   :  { %s318_s26 = smov [#allocation8]  }
   0x7   :  { %s36_s27 = sshll.u32 %s318_s26, 4  ;;  %s37_s27 = int_to_ptr.vmem [resolvable:$true] %s36_s27 }
   0x8   :  { %39 = dma.hbm_to_vmem [thread:$0]  %s35_s25, 128, %s37_s27, [#allocation9]  }
   0x9   :  { %309 = dma.done.wait [#allocation6], 128  }
   0xa   :  { %310 = vsyncadd [#allocation6], 4294967168 }
   0xb   :  { %311 = dma.done.wait [#allocation9], 128  }
   0xc   :  { %312 = vsyncadd [#allocation9], 4294967168  ;;  %vm59_vm0 = vcmask 261120   ;;  %v58_v0 = vld [vmem:[#allocation8] sm:$0xff]  ;;  %v55_v1 = vld [vmem:[#allocation5] sm:$0xff]  ;;  %vm52_vm1 = vcmask 7168   ;;  %v87_v3 = vstv %s383_s0 }
   0xd   :  { %193 = vmatpush.xpose.msk.msra.mxu0 %vm59_vm0, %v58_v0  ;;  %v319_v2 = vmov -inf   ;;  %vm89_vm2 = vcmask 64512   ;;  %v320_v7 = vmov 0   ;;  %v321_v8 = vmov 0.0   ;;  %s322_s0 = smov [#allocation10]   ;;  %s164_s6 = sshll.u32 %s387_s4, 4  ;;  %s165_s6 = int_to_ptr.hbm [resolvable:$true] %s164_s6 }
   0xe   :  { %53 = vst.msk [vmem:[#allocation2] sm:$0xff] %vm52_vm1, %v319_v2  ;;  %202 = vset.pattern.permute.xlu0 %v320_v7  ;;  %204 = vset.pattern.permute.xlu2 %v320_v7  ;;  %vm143_vm3 = vcmask 57344   ;;  %s162_s28 = sshll.u32 %s322_s0, 4  ;;  %s323_s8 = smov [#allocation11]   ;;  %s163_s28 = int_to_ptr.vmem [resolvable:$true] %s162_s28 }
   0xf   :  { %203 = vset.pattern.permute.xlu1 %v320_v7  ;;  %54 = vst.msk [vmem:[#allocation3] sm:$0xff] %vm52_vm1, %v321_v8  ;;  %s173_s9 = sshll.u32 %s323_s8, 4  ;;  %s175_s12 = sshll.u32 %s388_s5, 4  ;;  %s174_s9 = int_to_ptr.vmem [resolvable:$true] %s173_s9  ;;  %s176_s12 = int_to_ptr.hbm [resolvable:$true] %s175_s12 }
  0x10   :  { %194 = vmatmul.msk.f32.vlgmr.msra.gmra.mxu0 %vm59_vm0, %v55_v1 }
  0x15   :  { %v93_v9 = vld [vmem:[#allocation2] sm:$0xff] }
  0x16   :  { %v103_v31 = vld [vmem:[#allocation3] sm:$0xff] }
  0x8d   :  { %v83_v4 = vpop.f32.mrf.mxu0 }
  0x8e   :  { %v88_v5 = vmul.f32 %v87_v3, %v83_v4 }
  0x90   :  { %v90_v6 = vsel %vm89_vm2, %v88_v5, -inf }
  0x91   :  { %91 = vmax.xlane.f32.xlu0 %v90_v6 }
 0x104   :  { %v92_v10 = vpop.xlane.xlu0 %91 }
 0x105   :  { %v94_v11 = vmax.f32 %v93_v9, %v92_v10 }
 0x107   :  { %v104_v12 = vsub.f32 %v93_v9, %v94_v11  ;;  %114 = vst.msk [vmem:[#allocation2] sm:$0xff] %vm52_vm1, %v94_v11  ;;  %97 = vperm.xlu0 %202, %v94_v11   ;;  %v115_v13 = vsel %vm52_vm1, %v94_v11, -inf }
 0x108   :  { %v116_v14 = vrot.slane %v115_v13, 4 }
 0x109   :  { %v105_v29 = vmul.f32 1.442695, %v104_v12 }
 0x10a   :  { %v117_v15 = vmax.f32 %v115_v13, %v116_v14 }
 0x10c   :  { %v118_v16 = vrot.slane %v117_v15, 2 }
 0x10e   :  { %v119_v17 = vmax.f32 %v117_v15, %v118_v16  ;;  %v149_v38 = vld [vmem:[#allocation2] sm:$0xff] }
 0x110   :  { %v120_v18 = vrot.slane %v119_v17, 1 }
 0x112   :  { %v121_v19 = vmax.f32 %v119_v17, %v120_v18 }
 0x114   :  { %140 = vperm.xlu2 %204, %v121_v19   ;;  %v122_v20 = vsub.f32 %v94_v11, %v121_v19 }
 0x116   :  { %v123_v27 = vmul.f32 1.442695, %v122_v20 }
 0x16e   :  { %v141_v21 = vpop.permute.xlu2 %140 }
 0x16f   :  { %144 = vst.msk [vmem:[#allocation10] sm:$0x1] %vm143_vm3, %v141_v21 }
 0x170   :  { %167 = dma.vmem_to_hbm [thread:$0]  %s163_s28, 16, %s165_s6, [#allocation7]  }
 0x179   :  { %v98_v22 = vpop.permute.xlu0 %97 }
 0x17a   :  { %v100_v23 = vsub.f32 %v88_v5, %v98_v22 }
 0x17c   :  { %v101_v24 = vmul.f32 1.442695, %v100_v23 }
 0x17e   :  { %205 = vpow2.f32 %v101_v24 }
 0x17f   :  { %207 = vpow2.f32 %v123_v27 }
 0x180   :  { %209 = vpow2.f32 %v105_v29 }
 0x184   :  { %v206_v25 = vpop.eup %205 }
 0x185   :  { %v108_v26 = vsel %vm89_vm2, %v206_v25, 0.0  ;;  %v208_v28 = vpop.eup %207 }
 0x186   :  { %109 = vadd.xlane.f32.xlu1 %v108_v26  ;;  %v210_v30 = vpop.eup %209 }
 0x187   :  { %v107_v32 = vmul.f32 %v210_v30, %v103_v31 }
 0x19f   :  { %127 = vperm.xlu1 %203, %v208_v28  }
 0x1f9   :  { %v110_v33 = vpop.xlane.xlu1 %109 }
 0x1fa   :  { %v111_v34 = vadd.f32 %v110_v33, %v107_v32 }
 0x1fc   :  { %113 = vst.msk [vmem:[#allocation3] sm:$0xff] %vm52_vm1, %v111_v34 }
 0x203   :  { %v150_v35 = vld [vmem:[#allocation3] sm:$0xff] }
 0x204   :  { %211 = vlog2.f32 %v150_v35 }
 0x20a   :  { %v212_v36 = vpop.eup %211 }
 0x20b   :  { %v152_v37 = vmul.f32 0.6931472, %v212_v36 }
 0x20d   :  { %v153_v39 = vadd.f32 %v152_v37, %v149_v38 }
 0x20f   :  { %154 = vst.msk [vmem:[%s386_s3] sm:$0xff] %vm52_vm1, %v153_v39 }
 0x211   :  { %v128_v40 = vpop.permute.xlu1 %127 }
 0x212   :  { %v130_v41 = vmul.f32 %v206_v25, %v128_v40 }
 0x214   :  { %v131_v42 = vsel %vm89_vm2, %v130_v41, 0.0 }
 0x215   :  { %v132_v43 = vrot.slane %v131_v42, 4 }
 0x217   :  { %v133_v44 = vadd.f32 %v132_v43, %v131_v42 }
 0x219   :  { %v134_v45 = vrot.slane %v133_v44, 2 }
 0x21b   :  { %v135_v46 = vadd.f32 %v134_v45, %v133_v44 }
 0x21d   :  { %v136_v47 = vrot.slane %v135_v46, 1 }
 0x21f   :  { %v137_v48 = vadd.f32 %v136_v47, %v135_v46 }
 0x221   :  { %145 = vst.msk [vmem:[#allocation11] sm:$0x1] %vm143_vm3, %v137_v48 }
 0x222   :  { %178 = dma.vmem_to_hbm [thread:$0]  %s174_s9, 16, %s176_s12, [#allocation12]  }
 0x223   :  { %313 = dma.done.wait [#allocation7], 16  }
 0x224   :  { %314 = vsyncadd [#allocation7], 4294967280 }
 0x225   :  { %315 = dma.done.wait [#allocation12], 16  }
 0x226   :  { %316 = vsyncadd [#allocation12], 4294967280 }
 0x227   :  { %189 = vsyncpa [#allocation6], 1 }
 0x228   :  { %190 = vsyncpa [#allocation9], 1 }
 0x229   :  { %191 = vsyncpa [#allocation7], 1 }
 0x22a   :  { %192 = vsyncpa [#allocation12], 1 }

</bundles_post_ra>
